<compile_context>
chip_gen: v7x
topology: tpu7x:2x2x1
jax: 0.10.0
libtpu: 0.0.40
codegen_flags: <defaults>
</compile_context>

<pallas_src>
import functools

import jax
import jax.numpy as jnp
from jax import lax
from jax.experimental import pallas as pl
from jax.experimental.pallas import tpu as pltpu


def _round_up(x, m):
    return (x + m - 1) // m * m


def _vmem_limit_bytes():
    # Generation-dependent scoped-VMEM cap with a safe fallback.
    try:
        cap = int(getattr(pltpu.get_tpu_info(), "vmem_capacity_bytes"))
        return max(32 << 20, (cap * 3) // 4)      # 96 MiB on v5e/v6e, 48 MiB on v7x
    except Exception:
        return 48 << 20


def _cate_embed_kernel(off_ref, table_ref, gamma_ref, beta_ref, out_ref,
                       acc_ref, *, eps, tk):
    k = pl.program_id(1)

    @pl.when(k == 0)
    def _():
        acc_ref[...] = jnp.zeros_like(acc_ref)

    off = off_ref[...]                               # (TT, F) int32, pre-offset ids
    tt, num_feat = off.shape
    table = table_ref[...]                           # (tk, E) in MXU dtype
    mxu_dtype = table.dtype

    # Multi-hot restricted to the current table slice [k*tk, (k+1)*tk), built
    # directly in the MXU dtype (counts <= F are exact in bf16) with a short
    # static per-feature loop -- no 3-D intermediate, no sublane reduce.
    # TODO(synk): on v5e (no bf16 VALU) an f32 build + single cast before the
    # dot is marginally cheaper; not specialized per chip here.
    iota = lax.broadcasted_iota(jnp.int32, (tt, tk), 1) + k * tk
    multi = (off[:, 0:1] == iota).astype(mxu_dtype)
    for f in range(1, num_feat):
        multi = multi + (off[:, f:f + 1] == iota).astype(mxu_dtype)

    # Gather + feature-sum == matmul with the table slice (MXU), f32 accum.
    acc_ref[...] += jnp.dot(multi, table, preferred_element_type=jnp.float32)

    @pl.when(k == pl.num_programs(1) - 1)
    def _():
        emb_sum = acc_ref[...]                       # (TT, E) f32
        e = emb_sum.shape[-1]
        inv_e = jnp.float32(1.0 / e)
        mean = jnp.sum(emb_sum, axis=-1, keepdims=True) * inv_e
        cent = emb_sum - mean
        var = jnp.sum(cent * cent, axis=-1, keepdims=True) * inv_e
        norm = cent * lax.rsqrt(var + eps)
        out_ref[...] = (norm * gamma_ref[...] + beta_ref[...]).astype(out_ref.dtype)


def cate_feature_embedding(x, starts, emb_table, gamma, beta, *, eps=1e-5,
                           token_tile=1024, table_tile=512,
                           mxu_dtype=jnp.bfloat16):
    """x: (B, S, F) integer ids; returns (B, S, E) float32."""
    B, S, F = x.shape
    N = B * S
    num_emb, E = emb_table.shape

    # Token tile: sublane-aligned, padded so the grid divides evenly.
    tt = min(int(token_tile), _round_up(N, 8))
    tt = _round_up(tt, 8)
    n_pad = _round_up(N, tt)

    # Table (K) tile: sublane-aligned; keeps the (TT, tk) one-hot and the
    # (tk, E) table slice bounded regardless of num_emb.
    tk = min(int(table_tile), _round_up(num_emb, 8))
    tk = _round_up(tk, 8)
    k_pad = _round_up(num_emb, tk)

    # Fold starts into the ids once in XLA (removes one kernel input + add).
    off = (x.reshape(N, F).astype(jnp.int32)
           + starts.reshape(1, F).astype(jnp.int32))
    if n_pad != N:
        off = jnp.pad(off, ((0, n_pad - N), (0, 0)))   # padded rows dropped later

    # Cast the table ONCE in XLA (no per-grid-step in-kernel cast) and pad the
    # row axis; padded rows are never matched by valid ids.
    table = emb_table.astype(mxu_dtype)
    if k_pad != num_emb:
        table = jnp.pad(table, ((0, k_pad - num_emb), (0, 0)))

    gamma2 = gamma.reshape(1, E).astype(jnp.float32)
    beta2 = beta.reshape(1, E).astype(jnp.float32)

    # TODO(synk): PyTorch's host-side raise on x<0 / x>=num_uniq_values has no
    # in-kernel equivalent; out-of-range ids silently contribute zero.
    # TODO(synk): for production-size tables (num_emb in the thousands+) a
    # scalar-prefetch / DMA row-gather (O(N*F*E) bytes) beats this one-hot
    # matmul (O(N*num_emb) compares + MXU work); the K-streamed grid here only
    # bounds VMEM, not the total work.
    # TODO(synk): E=32 output is lane-sparse (masked vst); a packed lane-dense
    # store or bf16 output is only worth it if profiling shows the store slot
    # is the binding unit.

    out = pl.pallas_call(
        functools.partial(_cate_embed_kernel, eps=eps, tk=tk),
        out_shape=jax.ShapeDtypeStruct((n_pad, E), jnp.float32),
        grid_spec=pltpu.PrefetchScalarGridSpec(
            num_scalar_prefetch=0,
            grid=(n_pad // tt, k_pad // tk),
            in_specs=[
                pl.BlockSpec((tt, F), lambda i, k: (i, 0)),   # pre-offset ids
                pl.BlockSpec((tk, E), lambda i, k: (k, 0)),   # streamed table slice
                pl.BlockSpec((1, E), lambda i, k: (0, 0)),    # LN gamma
                pl.BlockSpec((1, E), lambda i, k: (0, 0)),    # LN beta
            ],
            out_specs=pl.BlockSpec((tt, E), lambda i, k: (i, 0)),
            scratch_shapes=[pltpu.VMEM((tt, E), jnp.float32)],
        ),
        compiler_params=pltpu.CompilerParams(
            dimension_semantics=("parallel", "arbitrary"),
            vmem_limit_bytes=_vmem_limit_bytes(),
        ),
    )(off, table, gamma2, beta2)
    return out[:N].reshape(B, S, E)


def _reference(x, starts, emb_table, gamma, beta, eps=1e-5):
    off = x + starts.reshape(1, 1, -1)
    emb = emb_table[off]                          # (B, S, F, E)
    s = emb.sum(axis=-2)                          # (B, S, E)
    mean = s.mean(axis=-1, keepdims=True)
    var = ((s - mean) ** 2).mean(axis=-1, keepdims=True)
    return (s - mean) / jnp.sqrt(var + eps) * gamma + beta


if __name__ == "__main__":
    # Module config (synthetic, deterministic).
    num_uniq_values = [5, 7, 3, 9]                # F = 4 categorical features
    embed_dim = 32
    B, S = 2, 8
    F = len(num_uniq_values)

    csum = jnp.cumsum(jnp.asarray(num_uniq_values, dtype=jnp.int32))
    num_emb = int(csum[-1])
    starts = jnp.concatenate(
        [jnp.zeros((1,), jnp.int32), csum[:-1]]).reshape(1, F)

    key = jax.random.PRNGKey(0)
    k_emb, k_x = jax.random.split(key)
    # nn.Embedding default init: N(0, 1). LayerNorm: weight=1, bias=0.
    emb_table = jax.random.normal(k_emb, (num_emb, embed_dim), jnp.float32)
    gamma = jnp.ones((embed_dim,), jnp.float32)
    beta = jnp.zeros((embed_dim,), jnp.float32)

    # Valid categorical ids: 0 <= x[..., f] < num_uniq_values[f].
    x_cols = []
    for nv in num_uniq_values:
        k_x, kf = jax.random.split(k_x)
        x_cols.append(jax.random.randint(kf, (B, S), 0, nv, jnp.int32))
    x = jnp.stack(x_cols, axis=-1)                # (B, S, F)

    ref = _reference(x, starts, emb_table, gamma, beta)

    # Bit-accurate f32 MXU path: must match the f32 reference tightly.
    out_f32 = cate_feature_embedding(x, starts, emb_table, gamma, beta,
                                     mxu_dtype=jnp.float32)
    out_f32 = jax.block_until_ready(out_f32)
    assert out_f32.shape == (B, S, embed_dim)
    assert jnp.allclose(out_f32, ref, rtol=1e-4, atol=1e-4), "f32 mismatch vs ref"

    # Default fast path: bf16 table + one-hot, f32 accumulation (accuracy
    # limited by the bf16 table values, not the exact 0/1 counts).
    out_bf16 = cate_feature_embedding(x, starts, emb_table, gamma, beta)
    out_bf16 = jax.block_until_ready(out_bf16)
    assert out_bf16.shape == (B, S, embed_dim)
    assert jnp.allclose(out_bf16, ref, rtol=5e-2, atol=5e-2), "bf16 mismatch vs ref"

    print("KERNEL_OK")
</pallas_src>

<mosaic_0001>
module attributes {stable_mosaic.version = 11 : i64} {
  func.func @_cate_embed_kernel(%arg0: i32, %arg1: i32, %arg2: memref<16x4xi32, #tpu.memory_space<vmem>>, %arg3: memref<24x32xf32, #tpu.memory_space<vmem>>, %arg4: memref<1x32xf32, #tpu.memory_space<vmem>>, %arg5: memref<1x32xf32, #tpu.memory_space<vmem>>, %arg6: memref<16x32xf32, #tpu.memory_space<vmem>>, %arg7: memref<16x32xf32, #tpu.memory_space<vmem>>) attributes {dimension_semantics = [#tpu.dimension_semantics<parallel>, #tpu.dimension_semantics<arbitrary>], iteration_bounds = array<i64: 1, 1>, scalar_prefetch = 0 : i64, scratch_operands = 1 : i64, tpu.core_type = #tpu.core_type<tc>, window_params = [{transform_indices = @transform_0, window_bounds = array<i64: 16, 4>}, {transform_indices = @transform_1, window_bounds = array<i64: 24, 32>}, {pipeline_mode = #tpu.pipeline_mode<synchronous>, transform_indices = @transform_2, window_bounds = array<i64: 1, 32>}, {pipeline_mode = #tpu.pipeline_mode<synchronous>, transform_indices = @transform_3, window_bounds = array<i64: 1, 32>}, {transform_indices = @transform_4, window_bounds = array<i64: 16, 32>}]} {
    %c0_i32 = arith.constant 0 : i32
    %0 = arith.cmpi eq, %arg1, %c0_i32 : i32
    %1 = arith.extui %0 : i1 to i32
    %c0_i32_0 = arith.constant 0 : i32
    %2 = arith.cmpi ne, %1, %c0_i32_0 : i32
    scf.if %2 {
      %cst_10 = arith.constant 0.000000e+00 : f32
      %39 = vector.broadcast %cst_10 : f32 to vector<16x32xf32>
      %c0_11 = arith.constant 0 : index
      %c0_12 = arith.constant 0 : index
      %40 = vector.load %arg7[%c0_11, %c0_12] : memref<16x32xf32, #tpu.memory_space<vmem>>, vector<16x32xf32>
      tpu.vector_store %arg7[%c0_11, %c0_12], %39 {strides = array<i32>} : memref<16x32xf32, #tpu.memory_space<vmem>>, vector<16x32xf32>,
    } else {
    }
    %c0 = arith.constant 0 : index
    %c0_1 = arith.constant 0 : index
    %3 = vector.load %arg2[%c0, %c0_1] : memref<16x4xi32, #tpu.memory_space<vmem>>, vector<16x4xi32>
    %c0_2 = arith.constant 0 : index
    %c0_3 = arith.constant 0 : index
    %4 = vector.load %arg3[%c0_2, %c0_3] : memref<24x32xf32, #tpu.memory_space<vmem>>, vector<24x32xf32>
    %5 = tpu.iota {dimensions = array<i32: 1>} : vector<16x24xi32>
    %c24_i32 = arith.constant 24 : i32
    %6 = arith.muli %arg1, %c24_i32 : i32
    %7 = vector.broadcast %6 : i32 to vector<16x24xi32>
    %8 = arith.addi %5, %7 : vector<16x24xi32>
    %9 = vector.extract_strided_slice %3 {offsets = [0, 0], sizes = [16, 1], strides = [1, 1]} : vector<16x4xi32> to vector<16x1xi32>
    %10 = vector.broadcast %9 : vector<16x1xi32> to vector<16x24xi32>
    %11 = arith.cmpi eq, %10, %8 : vector<16x24xi32>
    %12 = arith.extui %11 : vector<16x24xi1> to vector<16x24xi32>
    %13 = arith.sitofp %12 : vector<16x24xi32> to vector<16x24xf32>
    %14 = vector.extract_strided_slice %3 {offsets = [0, 1], sizes = [16, 1], strides = [1, 1]} : vector<16x4xi32> to vector<16x1xi32>
    %15 = vector.broadcast %14 : vector<16x1xi32> to vector<16x24xi32>
    %16 = arith.cmpi eq, %15, %8 : vector<16x24xi32>
    %17 = arith.extui %16 : vector<16x24xi1> to vector<16x24xi32>
    %18 = arith.sitofp %17 : vector<16x24xi32> to vector<16x24xf32>
    %19 = arith.addf %13, %18 : vector<16x24xf32>
    %20 = vector.extract_strided_slice %3 {offsets = [0, 2], sizes = [16, 1], strides = [1, 1]} : vector<16x4xi32> to vector<16x1xi32>
    %21 = vector.broadcast %20 : vector<16x1xi32> to vector<16x24xi32>
    %22 = arith.cmpi eq, %21, %8 : vector<16x24xi32>
    %23 = arith.extui %22 : vector<16x24xi1> to vector<16x24xi32>
    %24 = arith.sitofp %23 : vector<16x24xi32> to vector<16x24xf32>
    %25 = arith.addf %19, %24 : vector<16x24xf32>
    %26 = vector.extract_strided_slice %3 {offsets = [0, 3], sizes = [16, 1], strides = [1, 1]} : vector<16x4xi32> to vector<16x1xi32>
    %27 = vector.broadcast %26 : vector<16x1xi32> to vector<16x24xi32>
    %28 = arith.cmpi eq, %27, %8 : vector<16x24xi32>
    %29 = arith.extui %28 : vector<16x24xi1> to vector<16x24xi32>
    %30 = arith.sitofp %29 : vector<16x24xi32> to vector<16x24xf32>
    %31 = arith.addf %25, %30 : vector<16x24xf32>
    %c0_4 = arith.constant 0 : index
    %c0_5 = arith.constant 0 : index
    %32 = vector.load %arg7[%c0_4, %c0_5] : memref<16x32xf32, #tpu.memory_space<vmem>>, vector<16x32xf32>
    %cst = arith.constant dense<0.000000e+00> : vector<16x32xf32>
    %33 = tpu.matmul %31, %4, %cst {dimension_numbers = #tpu.dot_dimension_numbers<[1], [0], [0], [1], [0, 0, 1, 1], [], []>} : vector<16x24xf32>, vector<24x32xf32>, vector<16x32xf32> -> vector<16x32xf32>
    %34 = arith.addf %32, %33 : vector<16x32xf32>
    %c0_6 = arith.constant 0 : index
    %c0_7 = arith.constant 0 : index
    %35 = vector.load %arg7[%c0_6, %c0_7] : memref<16x32xf32, #tpu.memory_space<vmem>>, vector<16x32xf32>
    tpu.vector_store %arg7[%c0_6, %c0_7], %34 {strides = array<i32>} : memref<16x32xf32, #tpu.memory_space<vmem>>, vector<16x32xf32>,
    %c0_i32_8 = arith.constant 0 : i32
    %36 = arith.cmpi eq, %arg1, %c0_i32_8 : i32
    %37 = arith.extui %36 : i1 to i32
    %c0_i32_9 = arith.constant 0 : i32
    %38 = arith.cmpi ne, %37, %c0_i32_9 : i32
    scf.if %38 {
      %c0_10 = arith.constant 0 : index
      %c0_11 = arith.constant 0 : index
      %39 = vector.load %arg7[%c0_10, %c0_11] : memref<16x32xf32, #tpu.memory_space<vmem>>, vector<16x32xf32>
      %cst_12 = arith.constant dense<0.000000e+00> : vector<16xf32>
      %40 = vector.multi_reduction <add>, %39, %cst_12 [1] : vector<16x32xf32> to vector<16xf32>
      %41 = vector.shape_cast %40 : vector<16xf32> to vector<16x1xf32>
      %cst_13 = arith.constant 3.125000e-02 : f32
      %42 = vector.broadcast %cst_13 : f32 to vector<16x1xf32>
      %43 = arith.mulf %41, %42 : vector<16x1xf32>
      %44 = vector.broadcast %43 : vector<16x1xf32> to vector<16x32xf32>
      %45 = arith.subf %39, %44 : vector<16x32xf32>
      %46 = arith.mulf %45, %45 : vector<16x32xf32>
      %cst_14 = arith.constant dense<0.000000e+00> : vector<16xf32>
      %47 = vector.multi_reduction <add>, %46, %cst_14 [1] : vector<16x32xf32> to vector<16xf32>
      %48 = vector.shape_cast %47 : vector<16xf32> to vector<16x1xf32>
      %cst_15 = arith.constant 3.125000e-02 : f32
      %49 = vector.broadcast %cst_15 : f32 to vector<16x1xf32>
      %50 = arith.mulf %48, %49 : vector<16x1xf32>
      %cst_16 = arith.constant 9.99999974E-6 : f32
      %51 = vector.broadcast %cst_16 : f32 to vector<16x1xf32>
      %52 = arith.addf %50, %51 : vector<16x1xf32>
      %53 = math.rsqrt %52 : vector<16x1xf32>
      %54 = vector.broadcast %53 : vector<16x1xf32> to vector<16x32xf32>
      %55 = arith.mulf %45, %54 : vector<16x32xf32>
      %c0_17 = arith.constant 0 : index
      %c0_18 = arith.constant 0 : index
      %56 = vector.load %arg4[%c0_17, %c0_18] : memref<1x32xf32, #tpu.memory_space<vmem>>, vector<1x32xf32>
      %57 = vector.broadcast %56 : vector<1x32xf32> to vector<16x32xf32>
      %58 = arith.mulf %55, %57 : vector<16x32xf32>
      %c0_19 = arith.constant 0 : index
      %c0_20 = arith.constant 0 : index
      %59 = vector.load %arg5[%c0_19, %c0_20] : memref<1x32xf32, #tpu.memory_space<vmem>>, vector<1x32xf32>
      %60 = vector.broadcast %59 : vector<1x32xf32> to vector<16x32xf32>
      %61 = arith.addf %58, %60 : vector<16x32xf32>
      %c0_21 = arith.constant 0 : index
      %c0_22 = arith.constant 0 : index
      %62 = vector.load %arg6[%c0_21, %c0_22] : memref<16x32xf32, #tpu.memory_space<vmem>>, vector<16x32xf32>
      tpu.vector_store %arg6[%c0_21, %c0_22], %61 {strides = array<i32>} : memref<16x32xf32, #tpu.memory_space<vmem>>, vector<16x32xf32>,
    } else {
    }
    return
  }
  func.func @transform_0(%arg0: i32, %arg1: i32) -> (i32, i32) {
    %c0_i32 = arith.constant 0 : i32
    %c0_i32_0 = arith.constant 0 : i32
    return %arg0, %c0_i32 : i32, i32
  }
  func.func @transform_1(%arg0: i32, %arg1: i32) -> (i32, i32) {
    %c0_i32 = arith.constant 0 : i32
    %c0_i32_0 = arith.constant 0 : i32
    return %arg1, %c0_i32 : i32, i32
  }
  func.func @transform_2(%arg0: i32, %arg1: i32) -> (i32, i32) {
    %c0_i32 = arith.constant 0 : i32
    %c0_i32_0 = arith.constant 0 : i32
    %c0_i32_1 = arith.constant 0 : i32
    return %c0_i32, %c0_i32_0 : i32, i32
  }
  func.func @transform_3(%arg0: i32, %arg1: i32) -> (i32, i32) {
    %c0_i32 = arith.constant 0 : i32
    %c0_i32_0 = arith.constant 0 : i32
    %c0_i32_1 = arith.constant 0 : i32
    return %c0_i32, %c0_i32_0 : i32, i32
  }
  func.func @transform_4(%arg0: i32, %arg1: i32) -> (i32, i32) {
    %c0_i32 = arith.constant 0 : i32
    %c0_i32_0 = arith.constant 0 : i32
    return %arg0, %c0_i32 : i32, i32
  }
}

</mosaic_0001>

<bundles_post_ra>
// kernel: tpu_custom_call.1
= control target key start
LH: loop header
LB: loop body
LE: loop exit
PB: predicated region body
PF: predicated region fallthrough
CT: control target
= control target key end

     0   :  { %9 = vsyncpa [#allocation4], 0  ;;  %s445_s0 = inlined_call_operand.vmem [shape: s32[16,4], index: 0, kind: input, shape index: {}]   ;;  %s446_s1 = inlined_call_operand.hbm [shape: f32[24,32], index: 1, kind: input, shape index: {}]   ;;  %s447_s2 = inlined_call_operand.vmem [shape: f32[1,32], index: 2, kind: input, shape index: {}]   ;;  %s448_s3 = inlined_call_operand.vmem [shape: f32[1,32], index: 3, kind: input, shape index: {}]   ;;  %s449_s4 = inlined_call_operand.hbm [shape: f32[16,32], index: 4, kind: output, shape index: {}]  }
   0x1   :  { %10 = vsyncpa [#allocation5], 0  ;;  %s359_s15 = smov [#allocation3]   ;;  %s311_s19 = scalar_lea.hbm %s446_s1, 384 }
   0x2   :  { %s18_s16 = sshll.u32 %s359_s15, 4  ;;  %p312_p0 = scmp.ne.s32.totalorder %s446_s1, %s311_s19  ;;  %s19_s16 = int_to_ptr.vmem [resolvable:$true] %s18_s16 }
   0x3   :  { %p315_p1 = scmp.lt.u32.totalorder %s311_s19, %s446_s1 }
   0x5   :  { %p317_p2 = pnand %p315_p1, %p312_p0 }
   0x7   :  { %320 = shalt.err (!%p317_p2)
}
   0x8   :  { %s321_s24 = scalar_lea.vmem %s19_s16, 384  ;;  %p326_p4 = scmp.lt.s32.totalorder %s19_s16, %s19_s16 }
   0x9   :  { %p322_p3 = scmp.ne.s32.totalorder %s19_s16, %s321_s24  ;;  %p327_p5 = scmp.lt.s32.totalorder %s321_s24, %s321_s24 }
   0xb   :  { %p328_p6 = por %p327_p5, %p326_p4 }
   0xd   :  { %p329_p7 = pnand %p328_p6, %p322_p3 }
   0xf   :  { %332 = shalt.err (!%p329_p7)
}
  0x10   :  { %s360_s25 = smov 128   ;;  %s361_s26 = smov 8  }
  0x11   :  { %24 = dma.hbm_to_vmem [thread:$0]  %s446_s1, 384, %s19_s16, [#allocation4], %s360_s25, %s360_s25, %s361_s26  }
  0x12   :  { %355 = dma.done.wait [#allocation4], 384  }
  0x13   :  { %356 = vsyncadd [#allocation4], 4294966912  ;;  %v362_v0 = vmov 0   ;;  %v40_v1 = vld [vmem:[%s445_s0 + $0x8] sm:$0xff]  ;;  %v39_v2 = vld [vmem:[%s445_s0] sm:$0xff]  ;;  %v363_v3 = vmov 1   ;;  %v44_v11 = vlaneseq }
  0x14   :  { %301 = vset.pattern.permute.xlu1 %v362_v0  ;;  %299 = vset.pattern.permute.xlu0 %v362_v0  ;;  %v364_v4 = vmov 2   ;;  %v365_v5 = vmov 3   ;;  %v41_v6 = vld [vmem:[#allocation3] sm:$0xff]  ;;  %v42_v7 = vld [vmem:[#allocation3 + $0x8] sm:$0xff]  ;;  %v43_v9 = vld [vmem:[#allocation3 + $0x10] sm:$0xff]  ;;  %vm36_vm0 = vcmask 261120  }
  0x15   :  { %53 = vperm.xlu1 %301, %v40_v1   ;;  %50 = vperm.xlu0 %299, %v39_v2   ;;  %v286_v8 = vpack.c.bf16 %v42_v7, %v41_v6  ;;  %v366_v10 = vmov 0.0   ;;  %v45_v14 = vand.u32 127, %v44_v11  ;;  %vm105_vm8 = vcmask 195584   ;;  %v270_v62 = vld [vmem:[%s447_s2] ss:$0 sm:$0xff]  ;;  %s367_s9 = smov [#allocation6]  }
  0x16   :  { %38 = vst.msk [vmem:[#allocation2 + $0x8] sm:$0xff] %vm36_vm0, %v366_v10  ;;  %37 = vst.msk [vmem:[#allocation2] sm:$0xff] %vm36_vm0, %v366_v10  ;;  %v271_v0 = vld [vmem:[%s448_s3] ss:$0 sm:$0xff]  ;;  %s248_s10 = sshll.u32 %s367_s9, 4  ;;  %s249_s10 = int_to_ptr.vmem [resolvable:$true] %s248_s10 }
  0x17   :  { %287 = vmatprep.subr.bf16.mxu0 %v286_v8  ;;  %s333_s11 = scalar_lea.vmem %s249_s10, 256  ;;  %p338_p9 = scmp.lt.s32.totalorder %s249_s10, %s249_s10 }
  0x18   :  { %289 = vmatpush3.bf16.msra.mxu0 %v286_v8  ;;  %p334_p8 = scmp.ne.s32.totalorder %s249_s10, %s333_s11  ;;  %p339_p10 = scmp.lt.s32.totalorder %s333_s11, %s333_s11 }
  0x19   :  { %302 = vset.pattern.permute.xlu1 %v363_v3  ;;  %300 = vset.pattern.permute.xlu0 %v363_v3 }
  0x1a   :  { %65 = vperm.xlu1 %302, %v40_v1   ;;  %62 = vperm.xlu0 %300, %v39_v2   ;;  %p340_p11 = por %p339_p10, %p338_p9 }
  0x1b   :  { %281 = vmatprep.subr.mxu0 %v43_v9 }
  0x1c   :  { %282 = vmatpush3.msra.mxu0 %v43_v9  ;;  %p341_p12 = pnand %p340_p11, %p334_p8 }
  0x1d   :  { %v104_v35 = vld [vmem:[#allocation2 + $0x8] sm:$0xff]  ;;  %v103_v36 = vld [vmem:[#allocation2] sm:$0xff] }
  0x1e   :  { %303 = vset.pattern.permute.xlu1 %v364_v4  ;;  %304 = vset.pattern.permute.xlu0 %v364_v4 }
  0x1f   :  { %76 = vperm.xlu1 %303, %v39_v2   ;;  %79 = vperm.xlu0 %304, %v40_v1  }
  0x23   :  { %305 = vset.pattern.permute.xlu1 %v365_v5  ;;  %306 = vset.pattern.permute.xlu0 %v365_v5 }
  0x24   :  { %90 = vperm.xlu1 %305, %v39_v2  }
  0x28   :  { %93 = vperm.xlu1 %305, %v40_v1  }
  0x94   :  { %v54_v12 = vpop.permute.xlu1 %53  ;;  %v51_v13 = vpop.permute.xlu0 %50 }
  0x95   :  { %vm55_vm1 = vcmp.eq.s32.totalorder %v51_v13, %v45_v14  ;;  %vm56_vm5 = vcmp.eq.s32.totalorder %v54_v12, %v45_v14 }
  0x96   :  { %v260_v17 = vsel %vm55_vm1, 1.0, %v366_v10  ;;  %v261_v26 = vsel %vm56_vm5, 1.0, %v366_v10 }
  0x99   :  { %v66_v15 = vpop.permute.xlu1 %65  ;;  %v63_v16 = vpop.permute.xlu0 %62 }
  0x9a   :  { %vm67_vm2 = vcmp.eq.s32.totalorder %v63_v16, %v45_v14  ;;  %vm68_vm4 = vcmp.eq.s32.totalorder %v66_v15, %v45_v14 }
  0x9b   :  { %v262_v18 = vsel %vm67_vm2, 1.0, %v366_v10  ;;  %v263_v23 = vsel %vm68_vm4, 1.0, %v366_v10 }
  0x9c   :  { %v73_v21 = vadd.f32 %v262_v18, %v260_v17  ;;  %v74_v29 = vadd.f32 %v263_v23, %v261_v26 }
  0x9e   :  { %v77_v19 = vpop.permute.xlu1 %76  ;;  %v80_v20 = vpop.permute.xlu0 %79 }
  0x9f   :  { %vm81_vm3 = vcmp.eq.s32.totalorder %v77_v19, %v45_v14  ;;  %vm82_vm6 = vcmp.eq.s32.totalorder %v80_v20, %v45_v14 }
  0xa0   :  { %v264_v22 = vsel %vm81_vm3, 1.0, %v366_v10  ;;  %v265_v27 = vsel %vm82_vm6, 1.0, %v366_v10 }
  0xa1   :  { %v87_v25 = vadd.f32 %v264_v22, %v73_v21  ;;  %v88_v32 = vadd.f32 %v265_v27, %v74_v29 }
  0xa3   :  { %v91_v24 = vpop.permute.xlu1 %90 }
  0xa4   :  { %vm95_vm7 = vcmp.eq.s32.totalorder %v91_v24, %v45_v14 }
  0xa5   :  { %v266_v28 = vsel %vm95_vm7, 1.0, %v366_v10 }
  0xa6   :  { %v101_v30 = vadd.f32 %v266_v28, %v87_v25 }
  0xa7   :  { %v94_v31 = vpop.permute.xlu1 %93 }
  0xa8   :  { %vm96_vm9 = vcmp.eq.s32.totalorder %v94_v31, %v45_v14  ;;  %283 = vmatprep.mubr.msk.f32.mxu0 %vm105_vm8, %v101_v30 }
  0xa9   :  { %v267_v33 = vsel %vm96_vm9, 1.0, %v366_v10 }
  0xaa   :  { %v102_v34 = vadd.f32 %v267_v33, %v88_v32 }
  0xac   :  { %284 = vmatmul.mubr.msk.f32.vlgmr.msra.gmra.mrb[0].mxu0 %vm105_vm8, %v102_v34 }
 0x17f   :  { %v285_v37 = vpop.f32.mrb[0].mxu0 }
 0x180   :  { %v188_v38 = vadd.f32 %v285_v37, %v104_v35  ;;  %v178_v39 = vpop.f32.mrb[1].mxu0 }
 0x181   :  { %v187_v40 = vadd.f32 %v178_v39, %v103_v36 }
 0x182   :  { %191 = vst.msk [vmem:[#allocation2 + $0x8] sm:$0xff] %vm36_vm0, %v188_v38 }
 0x183   :  { %190 = vst.msk [vmem:[#allocation2] sm:$0xff] %vm36_vm0, %v187_v40 }
 0x189   :  { %v196_v41 = vld [vmem:[#allocation2 + $0x8] sm:$0xff] }
 0x18a   :  { %v200_v42 = vsel %vm36_vm0, %v196_v41, 0.0  ;;  %v195_v43 = vld [vmem:[#allocation2] sm:$0xff] }
 0x18b   :  { %201 = vadd.xlane.f32.xlu1 %v200_v42  ;;  %v197_v44 = vsel %vm36_vm0, %v195_v43, 0.0 }
 0x18c   :  { %198 = vadd.xlane.f32.xlu0 %v197_v44 }
 0x218   :  { %v202_v45 = vpop.xlane.xlu1 %201 }
 0x219   :  { %v204_v46 = vmul.f32 0.03125, %v202_v45  ;;  %v199_v47 = vpop.xlane.xlu0 %198 }
 0x21a   :  { %v203_v48 = vmul.f32 0.03125, %v199_v47 }
 0x21b   :  { %v206_v49 = vsub.f32 %v196_v41, %v204_v46 }
 0x21c   :  { %v205_v50 = vsub.f32 %v195_v43, %v203_v48 }
 0x21d   :  { %v208_v53 = vmul.f32 %v206_v49, %v206_v49 }
 0x21e   :  { %v207_v51 = vmul.f32 %v205_v50, %v205_v50 }
 0x21f   :  { %v212_v54 = vsel %vm36_vm0, %v208_v53, 0.0 }
 0x220   :  { %v209_v52 = vsel %vm36_vm0, %v207_v51, 0.0 }
 0x221   :  { %210 = vadd.xlane.f32.xlu0 %v209_v52 }
 0x225   :  { %213 = vadd.xlane.f32.xlu0 %v212_v54 }
 0x2ae   :  { %v211_v55 = vpop.xlane.xlu0 %210 }
 0x2af   :  { %v215_v56 = vmul.f32 0.03125, %v211_v55 }
 0x2b1   :  { %v217_v57 = vadd.f32 1e-05, %v215_v56 }
 0x2b2   :  { %v214_v58 = vpop.xlane.xlu0 %213 }
 0x2b3   :  { %307 = vrsqrt.f32 %v217_v57  ;;  %v216_v59 = vmul.f32 0.03125, %v214_v58 }
 0x2b5   :  { %v218_v60 = vadd.f32 1e-05, %v216_v59 }
 0x2b7   :  { %309 = vrsqrt.f32 %v218_v60 }
 0x2bd   :  { %v308_v61 = vpop.eup %307 }
 0x2be   :  { %v221_v63 = vmul.f32 %v308_v61, %v205_v50 }
 0x2c0   :  { %v230_v1 = vmul.f32 %v270_v62, %v221_v63 }
 0x2c1   :  { %v310_v2 = vpop.eup %309 }
 0x2c2   :  { %v222_v3 = vmul.f32 %v310_v2, %v206_v49  ;;  %v239_v4 = vadd.f32 %v271_v0, %v230_v1 }
 0x2c4   :  { %v231_v5 = vmul.f32 %v270_v62, %v222_v3  ;;  %241 = vst.msk [vmem:[#allocation6] sm:$0xff] %vm36_vm0, %v239_v4 }
 0x2c6   :  { %v240_v6 = vadd.f32 %v271_v0, %v231_v5 }
 0x2c8   :  { %242 = vst.msk [vmem:[#allocation6 + $0x8] sm:$0xff] %vm36_vm0, %v240_v6 }
 0x2c9   :  { %344 = shalt.err (!%p341_p12)
}
 0x2ca   :  { %s345_s12 = scalar_lea.hbm %s449_s4, 256 }
 0x2cb   :  { %p346_p13 = scmp.ne.s32.totalorder %s449_s4, %s345_s12  ;;  %p349_p0 = scmp.lt.u32.totalorder %s345_s12, %s449_s4 }
 0x2cd   :  { %p351_p1 = pnand %p349_p0, %p346_p13 }
 0x2cf   :  { %354 = shalt.err (!%p351_p1)
}
 0x2d0   :  { %254 = dma.vmem_to_hbm [thread:$0]  %s249_s10, 256, %s449_s4, [#allocation5], %s360_s25, %s360_s25, %s361_s26  }
 0x2d1   :  { %357 = dma.done.wait [#allocation5], 256  }
 0x2d2   :  { %358 = vsyncadd [#allocation5], 4294967040 }
 0x2d3   :  { %258 = vsyncpa [#allocation4], 1 }
 0x2d4   :  { %259 = vsyncpa [#allocation5], 1 }

</bundles_post_ra>
